<compile_context>
chip_gen: v7x
topology: tpu7x:2x2x1
jax: 0.10.0
libtpu: 0.0.40
codegen_flags: <defaults>
</compile_context>

<pallas_src>
import functools

import jax
import jax.numpy as jnp
from jax.experimental import pallas as pl
from jax.experimental.pallas import tpu as pltpu

N_PAD = 128  # lane-dense padded output width for the linear head


def lstm_fast_kernel(x_ref, feat_ref, wxs_ref, wxf_ref, wh_ref, b_ref,
                     wo_ref, bo_ref, out_ref):
    """Single-invocation fused-gate LSTM + linear head.

    x_ref   : (T*B, D_stock)  time-major flattened stock series
    feat_ref: (B, D_feat)     slow-learner representation
    wxs_ref : (D_stock, 4H)   stock->gates weights, gate order (i, f, g, o)
    wxf_ref : (D_feat, 4H)    feat->gates weights
    wh_ref  : (H, 4H)         hidden->gates weights
    b_ref   : (1, 4H)         gate bias (b_ih + b_hh pre-summed)
    wo_ref  : (H, N_PAD)      linear head weight (lane-padded)
    bo_ref  : (1, N_PAD)      linear head bias (lane-padded)
    out_ref : (B, N_PAD)      lane-dense output slab
    """
    B = feat_ref.shape[0]
    T = x_ref.shape[0] // B
    H = wh_ref.shape[0]

    # Hoisted loads / time-invariant terms (computed once).
    wh = wh_ref[...]                                                 # (H, 4H)
    gate_bias = (jnp.dot(feat_ref[...], wxf_ref[...],
                         preferred_element_type=jnp.float32)
                 + b_ref[...])                                       # (B, 4H)

    # One big MXU matmul for the whole input projection (all timesteps).
    xproj = jnp.dot(x_ref[...], wxs_ref[...],
                    preferred_element_type=jnp.float32)              # (T*B, 4H)

    h = jnp.zeros((B, H), jnp.float32)
    c = jnp.zeros((B, H), jnp.float32)

    # T is static and small: full unroll keeps h/c in registers and lets the
    # scheduler overlap EUP transcendentals with the next step's MXU push.
    for t in range(T):
        gates = (xproj[t * B:(t + 1) * B, :]
                 + gate_bias
                 + jnp.dot(h, wh, preferred_element_type=jnp.float32))  # (B, 4H)
        i = jax.nn.sigmoid(gates[:, 0 * H:1 * H])
        f = jax.nn.sigmoid(gates[:, 1 * H:2 * H])
        g = jnp.tanh(gates[:, 2 * H:3 * H])
        o = jax.nn.sigmoid(gates[:, 3 * H:4 * H])
        c = f * c + i * g
        h = o * jnp.tanh(c)

    out_ref[...] = (jnp.dot(h, wo_ref[...], preferred_element_type=jnp.float32)
                    + bo_ref[...])


@functools.partial(jax.jit, static_argnames=("n_out",))
def fast_learner_market_forward(stock, feat, params, *, n_out):
    """stock: (B, T, D_stock) f32, feat: (B, D_feat) f32 -> (B, n_out) f32."""
    B, T, Ds = stock.shape
    # Only remaining wrapper op: go time-major (contiguous (B, Ds) slab per
    # step). The feat broadcast / concat of the original formulation is folded
    # into the kernel as a time-invariant gate bias.
    x = jnp.transpose(stock, (1, 0, 2)).reshape(T * B, Ds).astype(jnp.float32)

    wxs, wxf, wh, b, wo_p, bo_p = params
    n_pad = wo_p.shape[-1]
    vmem = pl.BlockSpec(memory_space=pltpu.MemorySpace.VMEM)

    out = pl.pallas_call(
        lstm_fast_kernel,
        out_shape=jax.ShapeDtypeStruct((B, n_pad), jnp.float32),
        in_specs=[vmem] * 8,
        out_specs=vmem,
    )(x, feat.astype(jnp.float32), wxs, wxf, wh, b, wo_p, bo_p)
    return out[:, :n_out]


def init_params(key, d_stock, d_feat, hidden, n_out):
    """Fused-gate LSTM parameters; head weights lane-padded to N_PAD."""
    k = jax.random.split(key, 6)
    scale = 0.1
    G = 4 * hidden
    wxs = scale * jax.random.normal(k[0], (d_stock, G), jnp.float32)
    wxf = scale * jax.random.normal(k[1], (d_feat, G), jnp.float32)
    wh = scale * jax.random.normal(k[2], (hidden, G), jnp.float32)
    b = scale * jax.random.normal(k[3], (1, G), jnp.float32)
    wo = scale * jax.random.normal(k[4], (hidden, n_out), jnp.float32)
    bo = scale * jax.random.normal(k[5], (1, n_out), jnp.float32)
    # Lane-dense head: pad the output dim to a full 128-lane width once, at
    # init time, so the kernel's single store is an unmasked vst.
    wo_p = jnp.zeros((hidden, N_PAD), jnp.float32).at[:, :n_out].set(wo)
    bo_p = jnp.zeros((1, N_PAD), jnp.float32).at[:, :n_out].set(bo)
    return (wxs, wxf, wh, b, wo_p, bo_p)


def reference_forward(stock, feat, params, n_out):
    """Pure-JAX reference of the same fused-gate LSTM for a sanity check."""
    wxs, wxf, wh, b, wo_p, bo_p = params
    B, T, _ = stock.shape
    H = wh.shape[0]
    h = jnp.zeros((B, H), jnp.float32)
    c = jnp.zeros((B, H), jnp.float32)
    for t in range(T):
        x_t = stock[:, t, :]
        gates = x_t @ wxs + feat @ wxf + b + h @ wh
        i = jax.nn.sigmoid(gates[:, 0 * H:1 * H])
        f = jax.nn.sigmoid(gates[:, 1 * H:2 * H])
        g = jnp.tanh(gates[:, 2 * H:3 * H])
        o = jax.nn.sigmoid(gates[:, 3 * H:4 * H])
        c = f * c + i * g
        h = o * jnp.tanh(c)
    return (h @ wo_p + bo_p)[:, :n_out]


if __name__ == "__main__":
    B, T = 8, 8              # batch, sequence length
    D_STOCK, D_FEAT = 12, 4
    HIDDEN, N_OUT = 32, 8    # 4*HIDDEN = 128 -> gate slab is one lane width

    key = jax.random.PRNGKey(0)
    k_stock, k_feat, k_param = jax.random.split(key, 3)
    stock = jax.random.normal(k_stock, (B, T, D_STOCK), jnp.float32)
    feat = jax.random.normal(k_feat, (B, D_FEAT), jnp.float32)
    params = init_params(k_param, D_STOCK, D_FEAT, HIDDEN, N_OUT)

    out = fast_learner_market_forward(stock, feat, params, n_out=N_OUT)
    out = jax.block_until_ready(out)

    ref = reference_forward(stock, feat, params, N_OUT)
    assert out.shape == (B, N_OUT)
    assert jnp.allclose(out, ref, rtol=1e-3, atol=1e-3), "mismatch vs reference"

    print("KERNEL_OK")
</pallas_src>

<mosaic_0001>
module attributes {stable_mosaic.version = 11 : i64} {
  func.func @lstm_fast_kernel(%arg0: memref<64x12xf32, #tpu.memory_space<vmem>>, %arg1: memref<8x4xf32, #tpu.memory_space<vmem>>, %arg2: memref<12x128xf32, #tpu.memory_space<vmem>>, %arg3: memref<4x128xf32, #tpu.memory_space<vmem>>, %arg4: memref<32x128xf32, #tpu.memory_space<vmem>>, %arg5: memref<1x128xf32, #tpu.memory_space<vmem>>, %arg6: memref<32x128xf32, #tpu.memory_space<vmem>>, %arg7: memref<1x128xf32, #tpu.memory_space<vmem>>, %arg8: memref<8x128xf32, #tpu.memory_space<vmem>>) attributes {dimension_semantics = [], scalar_prefetch = 0 : i64, scratch_operands = 0 : i64, tpu.core_type = #tpu.core_type<tc>} {
    %c0 = arith.constant 0 : index
    %c0_0 = arith.constant 0 : index
    %0 = vector.load %arg4[%c0, %c0_0] : memref<32x128xf32, #tpu.memory_space<vmem>>, vector<32x128xf32>
    %c0_1 = arith.constant 0 : index
    %c0_2 = arith.constant 0 : index
    %1 = vector.load %arg1[%c0_1, %c0_2] : memref<8x4xf32, #tpu.memory_space<vmem>>, vector<8x4xf32>
    %c0_3 = arith.constant 0 : index
    %c0_4 = arith.constant 0 : index
    %2 = vector.load %arg3[%c0_3, %c0_4] : memref<4x128xf32, #tpu.memory_space<vmem>>, vector<4x128xf32>
    %cst = arith.constant dense<0.000000e+00> : vector<8x128xf32>
    %3 = tpu.matmul %1, %2, %cst {dimension_numbers = #tpu.dot_dimension_numbers<[1], [0], [0], [1], [0, 0, 1, 1], [], []>} : vector<8x4xf32>, vector<4x128xf32>, vector<8x128xf32> -> vector<8x128xf32>
    %c0_5 = arith.constant 0 : index
    %c0_6 = arith.constant 0 : index
    %4 = vector.load %arg5[%c0_5, %c0_6] : memref<1x128xf32, #tpu.memory_space<vmem>>, vector<1x128xf32>
    %5 = vector.broadcast %4 : vector<1x128xf32> to vector<8x128xf32>
    %6 = arith.addf %3, %5 : vector<8x128xf32>
    %c0_7 = arith.constant 0 : index
    %c0_8 = arith.constant 0 : index
    %7 = vector.load %arg0[%c0_7, %c0_8] : memref<64x12xf32, #tpu.memory_space<vmem>>, vector<64x12xf32>
    %c0_9 = arith.constant 0 : index
    %c0_10 = arith.constant 0 : index
    %8 = vector.load %arg2[%c0_9, %c0_10] : memref<12x128xf32, #tpu.memory_space<vmem>>, vector<12x128xf32>
    %cst_11 = arith.constant dense<0.000000e+00> : vector<64x128xf32>
    %9 = tpu.matmul %7, %8, %cst_11 {dimension_numbers = #tpu.dot_dimension_numbers<[1], [0], [0], [1], [0, 0, 1, 1], [], []>} : vector<64x12xf32>, vector<12x128xf32>, vector<64x128xf32> -> vector<64x128xf32>
    %cst_12 = arith.constant 0.000000e+00 : f32
    %10 = vector.broadcast %cst_12 : f32 to vector<8x32xf32>
    %cst_13 = arith.constant 0.000000e+00 : f32
    %11 = vector.broadcast %cst_13 : f32 to vector<8x32xf32>
    %12 = vector.extract_strided_slice %9 {offsets = [0, 0], sizes = [8, 128], strides = [1, 1]} : vector<64x128xf32> to vector<8x128xf32>
    %13 = arith.addf %12, %6 : vector<8x128xf32>
    %cst_14 = arith.constant dense<0.000000e+00> : vector<8x128xf32>
    %14 = tpu.matmul %10, %0, %cst_14 {dimension_numbers = #tpu.dot_dimension_numbers<[1], [0], [0], [1], [0, 0, 1, 1], [], []>} : vector<8x32xf32>, vector<32x128xf32>, vector<8x128xf32> -> vector<8x128xf32>
    %15 = arith.addf %13, %14 : vector<8x128xf32>
    %16 = vector.extract_strided_slice %15 {offsets = [0, 0], sizes = [8, 32], strides = [1, 1]} : vector<8x128xf32> to vector<8x32xf32>
    %17 = arith.negf %16 : vector<8x32xf32>
    %18 = math.exp %17 : vector<8x32xf32>
    %cst_15 = arith.constant 1.000000e+00 : f32
    %19 = vector.broadcast %cst_15 : f32 to vector<8x32xf32>
    %20 = arith.addf %19, %18 : vector<8x32xf32>
    %21 = arith.divf %19, %20 : vector<8x32xf32>
    %22 = vector.extract_strided_slice %15 {offsets = [0, 32], sizes = [8, 32], strides = [1, 1]} : vector<8x128xf32> to vector<8x32xf32>
    %23 = arith.negf %22 : vector<8x32xf32>
    %24 = math.exp %23 : vector<8x32xf32>
    %cst_16 = arith.constant 1.000000e+00 : f32
    %25 = vector.broadcast %cst_16 : f32 to vector<8x32xf32>
    %26 = arith.addf %25, %24 : vector<8x32xf32>
    %27 = arith.divf %25, %26 : vector<8x32xf32>
    %28 = vector.extract_strided_slice %15 {offsets = [0, 64], sizes = [8, 32], strides = [1, 1]} : vector<8x128xf32> to vector<8x32xf32>
    %29 = math.tanh %28 : vector<8x32xf32>
    %30 = vector.extract_strided_slice %15 {offsets = [0, 96], sizes = [8, 32], strides = [1, 1]} : vector<8x128xf32> to vector<8x32xf32>
    %31 = arith.negf %30 : vector<8x32xf32>
    %32 = math.exp %31 : vector<8x32xf32>
    %cst_17 = arith.constant 1.000000e+00 : f32
    %33 = vector.broadcast %cst_17 : f32 to vector<8x32xf32>
    %34 = arith.addf %33, %32 : vector<8x32xf32>
    %35 = arith.divf %33, %34 : vector<8x32xf32>
    %36 = arith.mulf %27, %11 : vector<8x32xf32>
    %37 = arith.mulf %21, %29 : vector<8x32xf32>
    %38 = arith.addf %36, %37 : vector<8x32xf32>
    %39 = math.tanh %38 : vector<8x32xf32>
    %40 = arith.mulf %35, %39 : vector<8x32xf32>
    %41 = vector.extract_strided_slice %9 {offsets = [8, 0], sizes = [8, 128], strides = [1, 1]} : vector<64x128xf32> to vector<8x128xf32>
    %42 = arith.addf %41, %6 : vector<8x128xf32>
    %cst_18 = arith.constant dense<0.000000e+00> : vector<8x128xf32>
    %43 = tpu.matmul %40, %0, %cst_18 {dimension_numbers = #tpu.dot_dimension_numbers<[1], [0], [0], [1], [0, 0, 1, 1], [], []>} : vector<8x32xf32>, vector<32x128xf32>, vector<8x128xf32> -> vector<8x128xf32>
    %44 = arith.addf %42, %43 : vector<8x128xf32>
    %45 = vector.extract_strided_slice %44 {offsets = [0, 0], sizes = [8, 32], strides = [1, 1]} : vector<8x128xf32> to vector<8x32xf32>
    %46 = arith.negf %45 : vector<8x32xf32>
    %47 = math.exp %46 : vector<8x32xf32>
    %cst_19 = arith.constant 1.000000e+00 : f32
    %48 = vector.broadcast %cst_19 : f32 to vector<8x32xf32>
    %49 = arith.addf %48, %47 : vector<8x32xf32>
    %50 = arith.divf %48, %49 : vector<8x32xf32>
    %51 = vector.extract_strided_slice %44 {offsets = [0, 32], sizes = [8, 32], strides = [1, 1]} : vector<8x128xf32> to vector<8x32xf32>
    %52 = arith.negf %51 : vector<8x32xf32>
    %53 = math.exp %52 : vector<8x32xf32>
    %cst_20 = arith.constant 1.000000e+00 : f32
    %54 = vector.broadcast %cst_20 : f32 to vector<8x32xf32>
    %55 = arith.addf %54, %53 : vector<8x32xf32>
    %56 = arith.divf %54, %55 : vector<8x32xf32>
    %57 = vector.extract_strided_slice %44 {offsets = [0, 64], sizes = [8, 32], strides = [1, 1]} : vector<8x128xf32> to vector<8x32xf32>
    %58 = math.tanh %57 : vector<8x32xf32>
    %59 = vector.extract_strided_slice %44 {offsets = [0, 96], sizes = [8, 32], strides = [1, 1]} : vector<8x128xf32> to vector<8x32xf32>
    %60 = arith.negf %59 : vector<8x32xf32>
    %61 = math.exp %60 : vector<8x32xf32>
    %cst_21 = arith.constant 1.000000e+00 : f32
    %62 = vector.broadcast %cst_21 : f32 to vector<8x32xf32>
    %63 = arith.addf %62, %61 : vector<8x32xf32>
    %64 = arith.divf %62, %63 : vector<8x32xf32>
    %65 = arith.mulf %56, %38 : vector<8x32xf32>
    %66 = arith.mulf %50, %58 : vector<8x32xf32>
    %67 = arith.addf %65, %66 : vector<8x32xf32>
    %68 = math.tanh %67 : vector<8x32xf32>
    %69 = arith.mulf %64, %68 : vector<8x32xf32>
    %70 = vector.extract_strided_slice %9 {offsets = [16, 0], sizes = [8, 128], strides = [1, 1]} : vector<64x128xf32> to vector<8x128xf32>
    %71 = arith.addf %70, %6 : vector<8x128xf32>
    %cst_22 = arith.constant dense<0.000000e+00> : vector<8x128xf32>
    %72 = tpu.matmul %69, %0, %cst_22 {dimension_numbers = #tpu.dot_dimension_numbers<[1], [0], [0], [1], [0, 0, 1, 1], [], []>} : vector<8x32xf32>, vector<32x128xf32>, vector<8x128xf32> -> vector<8x128xf32>
    %73 = arith.addf %71, %72 : vector<8x128xf32>
    %74 = vector.extract_strided_slice %73 {offsets = [0, 0], sizes = [8, 32], strides = [1, 1]} : vector<8x128xf32> to vector<8x32xf32>
    %75 = arith.negf %74 : vector<8x32xf32>
    %76 = math.exp %75 : vector<8x32xf32>
    %cst_23 = arith.constant 1.000000e+00 : f32
    %77 = vector.broadcast %cst_23 : f32 to vector<8x32xf32>
    %78 = arith.addf %77, %76 : vector<8x32xf32>
    %79 = arith.divf %77, %78 : vector<8x32xf32>
    %80 = vector.extract_strided_slice %73 {offsets = [0, 32], sizes = [8, 32], strides = [1, 1]} : vector<8x128xf32> to vector<8x32xf32>
    %81 = arith.negf %80 : vector<8x32xf32>
    %82 = math.exp %81 : vector<8x32xf32>
    %cst_24 = arith.constant 1.000000e+00 : f32
    %83 = vector.broadcast %cst_24 : f32 to vector<8x32xf32>
    %84 = arith.addf %83, %82 : vector<8x32xf32>
    %85 = arith.divf %83, %84 : vector<8x32xf32>
    %86 = vector.extract_strided_slice %73 {offsets = [0, 64], sizes = [8, 32], strides = [1, 1]} : vector<8x128xf32> to vector<8x32xf32>
    %87 = math.tanh %86 : vector<8x32xf32>
    %88 = vector.extract_strided_slice %73 {offsets = [0, 96], sizes = [8, 32], strides = [1, 1]} : vector<8x128xf32> to vector<8x32xf32>
    %89 = arith.negf %88 : vector<8x32xf32>
    %90 = math.exp %89 : vector<8x32xf32>
    %cst_25 = arith.constant 1.000000e+00 : f32
    %91 = vector.broadcast %cst_25 : f32 to vector<8x32xf32>
    %92 = arith.addf %91, %90 : vector<8x32xf32>
    %93 = arith.divf %91, %92 : vector<8x32xf32>
    %94 = arith.mulf %85, %67 : vector<8x32xf32>
    %95 = arith.mulf %79, %87 : vector<8x32xf32>
    %96 = arith.addf %94, %95 : vector<8x32xf32>
    %97 = math.tanh %96 : vector<8x32xf32>
    %98 = arith.mulf %93, %97 : vector<8x32xf32>
    %99 = vector.extract_strided_slice %9 {offsets = [24, 0], sizes = [8, 128], strides = [1, 1]} : vector<64x128xf32> to vector<8x128xf32>
    %100 = arith.addf %99, %6 : vector<8x128xf32>
    %cst_26 = arith.constant dense<0.000000e+00> : vector<8x128xf32>
    %101 = tpu.matmul %98, %0, %cst_26 {dimension_numbers = #tpu.dot_dimension_numbers<[1], [0], [0], [1], [0, 0, 1, 1], [], []>} : vector<8x32xf32>, vector<32x128xf32>, vector<8x128xf32> -> vector<8x128xf32>
    %102 = arith.addf %100, %101 : vector<8x128xf32>
    %103 = vector.extract_strided_slice %102 {offsets = [0, 0], sizes = [8, 32], strides = [1, 1]} : vector<8x128xf32> to vector<8x32xf32>
    %104 = arith.negf %103 : vector<8x32xf32>
    %105 = math.exp %104 : vector<8x32xf32>
    %cst_27 = arith.constant 1.000000e+00 : f32
    %106 = vector.broadcast %cst_27 : f32 to vector<8x32xf32>
    %107 = arith.addf %106, %105 : vector<8x32xf32>
    %108 = arith.divf %106, %107 : vector<8x32xf32>
    %109 = vector.extract_strided_slice %102 {offsets = [0, 32], sizes = [8, 32], strides = [1, 1]} : vector<8x128xf32> to vector<8x32xf32>
    %110 = arith.negf %109 : vector<8x32xf32>
    %111 = math.exp %110 : vector<8x32xf32>
    %cst_28 = arith.constant 1.000000e+00 : f32
    %112 = vector.broadcast %cst_28 : f32 to vector<8x32xf32>
    %113 = arith.addf %112, %111 : vector<8x32xf32>
    %114 = arith.divf %112, %113 : vector<8x32xf32>
    %115 = vector.extract_strided_slice %102 {offsets = [0, 64], sizes = [8, 32], strides = [1, 1]} : vector<8x128xf32> to vector<8x32xf32>
    %116 = math.tanh %115 : vector<8x32xf32>
    %117 = vector.extract_strided_slice %102 {offsets = [0, 96], sizes = [8, 32], strides = [1, 1]} : vector<8x128xf32> to vector<8x32xf32>
    %118 = arith.negf %117 : vector<8x32xf32>
    %119 = math.exp %118 : vector<8x32xf32>
    %cst_29 = arith.constant 1.000000e+00 : f32
    %120 = vector.broadcast %cst_29 : f32 to vector<8x32xf32>
    %121 = arith.addf %120, %119 : vector<8x32xf32>
    %122 = arith.divf %120, %121 : vector<8x32xf32>
    %123 = arith.mulf %114, %96 : vector<8x32xf32>
    %124 = arith.mulf %108, %116 : vector<8x32xf32>
    %125 = arith.addf %123, %124 : vector<8x32xf32>
    %126 = math.tanh %125 : vector<8x32xf32>
    %127 = arith.mulf %122, %126 : vector<8x32xf32>
    %128 = vector.extract_strided_slice %9 {offsets = [32, 0], sizes = [8, 128], strides = [1, 1]} : vector<64x128xf32> to vector<8x128xf32>
    %129 = arith.addf %128, %6 : vector<8x128xf32>
    %cst_30 = arith.constant dense<0.000000e+00> : vector<8x128xf32>
    %130 = tpu.matmul %127, %0, %cst_30 {dimension_numbers = #tpu.dot_dimension_numbers<[1], [0], [0], [1], [0, 0, 1, 1], [], []>} : vector<8x32xf32>, vector<32x128xf32>, vector<8x128xf32> -> vector<8x128xf32>
    %131 = arith.addf %129, %130 : vector<8x128xf32>
    %132 = vector.extract_strided_slice %131 {offsets = [0, 0], sizes = [8, 32], strides = [1, 1]} : vector<8x128xf32> to vector<8x32xf32>
    %133 = arith.negf %132 : vector<8x32xf32>
    %134 = math.exp %133 : vector<8x32xf32>
    %cst_31 = arith.constant 1.000000e+00 : f32
    %135 = vector.broadcast %cst_31 : f32 to vector<8x32xf32>
    %136 = arith.addf %135, %134 : vector<8x32xf32>
    %137 = arith.divf %135, %136 : vector<8x32xf32>
    %138 = vector.extract_strided_slice %131 {offsets = [0, 32], sizes = [8, 32], strides = [1, 1]} : vector<8x128xf32> to vector<8x32xf32>
    %139 = arith.negf %138 : vector<8x32xf32>
    %140 = math.exp %139 : vector<8x32xf32>
    %cst_32 = arith.constant 1.000000e+00 : f32
    %141 = vector.broadcast %cst_32 : f32 to vector<8x32xf32>
    %142 = arith.addf %141, %140 : vector<8x32xf32>
    %143 = arith.divf %141, %142 : vector<8x32xf32>
    %144 = vector.extract_strided_slice %131 {offsets = [0, 64], sizes = [8, 32], strides = [1, 1]} : vector<8x128xf32> to vector<8x32xf32>
    %145 = math.tanh %144 : vector<8x32xf32>
    %146 = vector.extract_strided_slice %131 {offsets = [0, 96], sizes = [8, 32], strides = [1, 1]} : vector<8x128xf32> to vector<8x32xf32>
    %147 = arith.negf %146 : vector<8x32xf32>
    %148 = math.exp %147 : vector<8x32xf32>
    %cst_33 = arith.constant 1.000000e+00 : f32
    %149 = vector.broadcast %cst_33 : f32 to vector<8x32xf32>
    %150 = arith.addf %149, %148 : vector<8x32xf32>
    %151 = arith.divf %149, %150 : vector<8x32xf32>
    %152 = arith.mulf %143, %125 : vector<8x32xf32>
    %153 = arith.mulf %137, %145 : vector<8x32xf32>
    %154 = arith.addf %152, %153 : vector<8x32xf32>
    %155 = math.tanh %154 : vector<8x32xf32>
    %156 = arith.mulf %151, %155 : vector<8x32xf32>
    %157 = vector.extract_strided_slice %9 {offsets = [40, 0], sizes = [8, 128], strides = [1, 1]} : vector<64x128xf32> to vector<8x128xf32>
    %158 = arith.addf %157, %6 : vector<8x128xf32>
    %cst_34 = arith.constant dense<0.000000e+00> : vector<8x128xf32>
    %159 = tpu.matmul %156, %0, %cst_34 {dimension_numbers = #tpu.dot_dimension_numbers<[1], [0], [0], [1], [0, 0, 1, 1], [], []>} : vector<8x32xf32>, vector<32x128xf32>, vector<8x128xf32> -> vector<8x128xf32>
    %160 = arith.addf %158, %159 : vector<8x128xf32>
    %161 = vector.extract_strided_slice %160 {offsets = [0, 0], sizes = [8, 32], strides = [1, 1]} : vector<8x128xf32> to vector<8x32xf32>
    %162 = arith.negf %161 : vector<8x32xf32>
    %163 = math.exp %162 : vector<8x32xf32>
    %cst_35 = arith.constant 1.000000e+00 : f32
    %164 = vector.broadcast %cst_35 : f32 to vector<8x32xf32>
    %165 = arith.addf %164, %163 : vector<8x32xf32>
    %166 = arith.divf %164, %165 : vector<8x32xf32>
    %167 = vector.extract_strided_slice %160 {offsets = [0, 32], sizes = [8, 32], strides = [1, 1]} : vector<8x128xf32> to vector<8x32xf32>
    %168 = arith.negf %167 : vector<8x32xf32>
    %169 = math.exp %168 : vector<8x32xf32>
    %cst_36 = arith.constant 1.000000e+00 : f32
    %170 = vector.broadcast %cst_36 : f32 to vector<8x32xf32>
    %171 = arith.addf %170, %169 : vector<8x32xf32>
    %172 = arith.divf %170, %171 : vector<8x32xf32>
    %173 = vector.extract_strided_slice %160 {offsets = [0, 64], sizes = [8, 32], strides = [1, 1]} : vector<8x128xf32> to vector<8x32xf32>
    %174 = math.tanh %173 : vector<8x32xf32>
    %175 = vector.extract_strided_slice %160 {offsets = [0, 96], sizes = [8, 32], strides = [1, 1]} : vector<8x128xf32> to vector<8x32xf32>
    %176 = arith.negf %175 : vector<8x32xf32>
    %177 = math.exp %176 : vector<8x32xf32>
    %cst_37 = arith.constant 1.000000e+00 : f32
    %178 = vector.broadcast %cst_37 : f32 to vector<8x32xf32>
    %179 = arith.addf %178, %177 : vector<8x32xf32>
    %180 = arith.divf %178, %179 : vector<8x32xf32>
    %181 = arith.mulf %172, %154 : vector<8x32xf32>
    %182 = arith.mulf %166, %174 : vector<8x32xf32>
    %183 = arith.addf %181, %182 : vector<8x32xf32>
    %184 = math.tanh %183 : vector<8x32xf32>
    %185 = arith.mulf %180, %184 : vector<8x32xf32>
    %186 = vector.extract_strided_slice %9 {offsets = [48, 0], sizes = [8, 128], strides = [1, 1]} : vector<64x128xf32> to vector<8x128xf32>
    %187 = arith.addf %186, %6 : vector<8x128xf32>
    %cst_38 = arith.constant dense<0.000000e+00> : vector<8x128xf32>
    %188 = tpu.matmul %185, %0, %cst_38 {dimension_numbers = #tpu.dot_dimension_numbers<[1], [0], [0], [1], [0, 0, 1, 1], [], []>} : vector<8x32xf32>, vector<32x128xf32>, vector<8x128xf32> -> vector<8x128xf32>
    %189 = arith.addf %187, %188 : vector<8x128xf32>
    %190 = vector.extract_strided_slice %189 {offsets = [0, 0], sizes = [8, 32], strides = [1, 1]} : vector<8x128xf32> to vector<8x32xf32>
    %191 = arith.negf %190 : vector<8x32xf32>
    %192 = math.exp %191 : vector<8x32xf32>
    %cst_39 = arith.constant 1.000000e+00 : f32
    %193 = vector.broadcast %cst_39 : f32 to vector<8x32xf32>
    %194 = arith.addf %193, %192 : vector<8x32xf32>
    %195 = arith.divf %193, %194 : vector<8x32xf32>
    %196 = vector.extract_strided_slice %189 {offsets = [0, 32], sizes = [8, 32], strides = [1, 1]} : vector<8x128xf32> to vector<8x32xf32>
    %197 = arith.negf %196 : vector<8x32xf32>
    %198 = math.exp %197 : vector<8x32xf32>
    %cst_40 = arith.constant 1.000000e+00 : f32
    %199 = vector.broadcast %cst_40 : f32 to vector<8x32xf32>
    %200 = arith.addf %199, %198 : vector<8x32xf32>
    %201 = arith.divf %199, %200 : vector<8x32xf32>
    %202 = vector.extract_strided_slice %189 {offsets = [0, 64], sizes = [8, 32], strides = [1, 1]} : vector<8x128xf32> to vector<8x32xf32>
    %203 = math.tanh %202 : vector<8x32xf32>
    %204 = vector.extract_strided_slice %189 {offsets = [0, 96], sizes = [8, 32], strides = [1, 1]} : vector<8x128xf32> to vector<8x32xf32>
    %205 = arith.negf %204 : vector<8x32xf32>
    %206 = math.exp %205 : vector<8x32xf32>
    %cst_41 = arith.constant 1.000000e+00 : f32
    %207 = vector.broadcast %cst_41 : f32 to vector<8x32xf32>
    %208 = arith.addf %207, %206 : vector<8x32xf32>
    %209 = arith.divf %207, %208 : vector<8x32xf32>
    %210 = arith.mulf %201, %183 : vector<8x32xf32>
    %211 = arith.mulf %195, %203 : vector<8x32xf32>
    %212 = arith.addf %210, %211 : vector<8x32xf32>
    %213 = math.tanh %212 : vector<8x32xf32>
    %214 = arith.mulf %209, %213 : vector<8x32xf32>
    %215 = vector.extract_strided_slice %9 {offsets = [56, 0], sizes = [8, 128], strides = [1, 1]} : vector<64x128xf32> to vector<8x128xf32>
    %216 = arith.addf %215, %6 : vector<8x128xf32>
    %cst_42 = arith.constant dense<0.000000e+00> : vector<8x128xf32>
    %217 = tpu.matmul %214, %0, %cst_42 {dimension_numbers = #tpu.dot_dimension_numbers<[1], [0], [0], [1], [0, 0, 1, 1], [], []>} : vector<8x32xf32>, vector<32x128xf32>, vector<8x128xf32> -> vector<8x128xf32>
    %218 = arith.addf %216, %217 : vector<8x128xf32>
    %219 = vector.extract_strided_slice %218 {offsets = [0, 0], sizes = [8, 32], strides = [1, 1]} : vector<8x128xf32> to vector<8x32xf32>
    %220 = arith.negf %219 : vector<8x32xf32>
    %221 = math.exp %220 : vector<8x32xf32>
    %cst_43 = arith.constant 1.000000e+00 : f32
    %222 = vector.broadcast %cst_43 : f32 to vector<8x32xf32>
    %223 = arith.addf %222, %221 : vector<8x32xf32>
    %224 = arith.divf %222, %223 : vector<8x32xf32>
    %225 = vector.extract_strided_slice %218 {offsets = [0, 32], sizes = [8, 32], strides = [1, 1]} : vector<8x128xf32> to vector<8x32xf32>
    %226 = arith.negf %225 : vector<8x32xf32>
    %227 = math.exp %226 : vector<8x32xf32>
    %cst_44 = arith.constant 1.000000e+00 : f32
    %228 = vector.broadcast %cst_44 : f32 to vector<8x32xf32>
    %229 = arith.addf %228, %227 : vector<8x32xf32>
    %230 = arith.divf %228, %229 : vector<8x32xf32>
    %231 = vector.extract_strided_slice %218 {offsets = [0, 64], sizes = [8, 32], strides = [1, 1]} : vector<8x128xf32> to vector<8x32xf32>
    %232 = math.tanh %231 : vector<8x32xf32>
    %233 = vector.extract_strided_slice %218 {offsets = [0, 96], sizes = [8, 32], strides = [1, 1]} : vector<8x128xf32> to vector<8x32xf32>
    %234 = arith.negf %233 : vector<8x32xf32>
    %235 = math.exp %234 : vector<8x32xf32>
    %cst_45 = arith.constant 1.000000e+00 : f32
    %236 = vector.broadcast %cst_45 : f32 to vector<8x32xf32>
    %237 = arith.addf %236, %235 : vector<8x32xf32>
    %238 = arith.divf %236, %237 : vector<8x32xf32>
    %239 = arith.mulf %230, %212 : vector<8x32xf32>
    %240 = arith.mulf %224, %232 : vector<8x32xf32>
    %241 = arith.addf %239, %240 : vector<8x32xf32>
    %242 = math.tanh %241 : vector<8x32xf32>
    %243 = arith.mulf %238, %242 : vector<8x32xf32>
    %c0_46 = arith.constant 0 : index
    %c0_47 = arith.constant 0 : index
    %244 = vector.load %arg6[%c0_46, %c0_47] : memref<32x128xf32, #tpu.memory_space<vmem>>, vector<32x128xf32>
    %cst_48 = arith.constant dense<0.000000e+00> : vector<8x128xf32>
    %245 = tpu.matmul %243, %244, %cst_48 {dimension_numbers = #tpu.dot_dimension_numbers<[1], [0], [0], [1], [0, 0, 1, 1], [], []>} : vector<8x32xf32>, vector<32x128xf32>, vector<8x128xf32> -> vector<8x128xf32>
    %c0_49 = arith.constant 0 : index
    %c0_50 = arith.constant 0 : index
    %246 = vector.load %arg7[%c0_49, %c0_50] : memref<1x128xf32, #tpu.memory_space<vmem>>, vector<1x128xf32>
    %247 = vector.broadcast %246 : vector<1x128xf32> to vector<8x128xf32>
    %248 = arith.addf %245, %247 : vector<8x128xf32>
    %c0_51 = arith.constant 0 : index
    %c0_52 = arith.constant 0 : index
    %249 = vector.load %arg8[%c0_51, %c0_52] : memref<8x128xf32, #tpu.memory_space<vmem>>, vector<8x128xf32>
    tpu.vector_store %arg8[%c0_51, %c0_52], %248 {strides = array<i32>} : memref<8x128xf32, #tpu.memory_space<vmem>>, vector<8x128xf32>,
    return
  }
}

</mosaic_0001>

<bundles_post_ra>
// kernel: fast_learner_market_forward.1
= control target key start
LH: loop header
LB: loop body
LE: loop exit
PB: predicated region body
PF: predicated region fallthrough
CT: control target
= control target key end

     0   :  { %vm47_vm0 = vcmask 1043456   ;;  %v1533_v2 = vmov 0.0   ;;  %vm1534_vm1 = vmmov 0   ;;  %vm43_vm2 = vcmask 31744   ;;  %s1789_s0 = inlined_call_operand.vmem [shape: f32[64,12], index: 0, kind: input, shape index: {}]   ;;  %s1790_s1 = inlined_call_operand.vmem [shape: f32[8,4], index: 1, kind: input, shape index: {}]   ;;  %s1791_s2 = inlined_call_operand.vmem [shape: f32[12,128], index: 2, kind: input, shape index: {}]   ;;  %s1792_s3 = inlined_call_operand.vmem [shape: f32[4,128], index: 3, kind: input, shape index: {}]   ;;  %s1793_s4 = inlined_call_operand.vmem [shape: f32[32,128], index: 4, kind: input, shape index: {}]   ;;  %s1794_s5 = inlined_call_operand.vmem [shape: f32[1,128], index: 5, kind: input, shape index: {}]   ;;  %s1795_s6 = inlined_call_operand.vmem [shape: f32[32,128], index: 6, kind: input, shape index: {}]   ;;  %s1796_s7 = inlined_call_operand.vmem [shape: f32[1,128], index: 7, kind: input, shape index: {}]   ;;  %s1797_s8 = inlined_call_operand.hbm [shape: f32[8,128], index: 8, kind: output, shape index: {}]  }
   0x1   :  { %v35_v0 = vld [vmem:[%s1792_s3] sm:$0xf]  ;;  %1258 = vmatprep.subr.mxu0 %v1533_v2  ;;  %1260 = vmatprep.mubr.msk.f32.mxu0 %vm1534_vm1, %v1533_v2  ;;  %v130_v4 = vld [vmem:[%s1791_s2 + $0x8] sm:$0xf]  ;;  %vm1535_vm3 = vmmov 1   ;;  %vm131_vm5 = vcmask 97280  }
   0x2   :  { %v34_v1 = vld [vmem:[%s1790_s1] sm:$0xff]  ;;  %1259 = vmatpush3.msk.msra.mxu0 %vm47_vm0, %v35_v0  ;;  %vm1379_vm4 = vmpackc.low %vm47_vm0, %vm1535_vm3  ;;  %v31_v7 = vld [vmem:[%s1793_s4 + $0x8] sm:$0xff]  ;;  %v1536_v8 = vmov 0.0|0.0  }
   0x3   :  { %v129_v3 = vld [vmem:[%s1791_s2] sm:$0xff]  ;;  %1261 = vmatmul.mubr.msk.f32.vlgmr.msra.gmra.mrb[0].mxu0 %vm43_vm2, %v34_v1  ;;  %1384 = vmatprep.subr.bf16.mxu0 %v1536_v8  ;;  %v32_v11 = vld [vmem:[%s1793_s4 + $0x10] sm:$0xff]  ;;  %v33_v12 = vld [vmem:[%s1793_s4 + $0x18] sm:$0xff] }
   0x4   :  { %v1378_v5 = vpack.c.bf16 %v130_v4, %v129_v3  ;;  %v30_v6 = vld [vmem:[%s1793_s4] sm:$0xff]  ;;  %v122_v13 = vld [vmem:[%s1789_s0 + $0x8] sm:$0xff]  ;;  %v1623_v14 = vpack.c.bf16 %v33_v12, %v32_v11  ;;  %v123_v15 = vld [vmem:[%s1789_s0 + $0x10] sm:$0xff]  ;;  %1287 = vmatprep.mubr.msk.f32.mxu0 %vm1534_vm1, %v1533_v2 }
   0x5   :  { %v1607_v9 = vpack.c.bf16 %v31_v7, %v30_v6  ;;  %v121_v10 = vld [vmem:[%s1789_s0] sm:$0xff] }
   0x6   :  { %1380 = vmatprep.subr.msk.bf16.mxu1 %vm1379_vm4, %v1378_v5  ;;  %1267 = vmatprep.mubr.msk.f32.mxu1 %vm131_vm5, %v121_v10 }
   0x7   :  { %1383 = vmatpush3.bf16.msk.msra.mxu1 %vm1379_vm4, %v1378_v5  ;;  %1386 = vmatpush3.bf16.msra.mxu0 %v1607_v9 }
   0x8   :  { %1387 = vmatprep.subr.bf16.mxu0 %v1536_v8 }
   0x9   :  { %13 = vsyncpa [#allocation3], 0  ;;  %1396 = vmatprep.subr.bf16.mxu1 %v1536_v8  ;;  %v124_v16 = vld [vmem:[%s1789_s0 + $0x18] sm:$0xff]  ;;  %v125_v17 = vld [vmem:[%s1789_s0 + $0x20] sm:$0xff]  ;;  %vm265_vm6 = vcmask 261120  }
   0xa   :  { %1268 = vmatmul.mubr.msk.f32.vlgmr.msra.gmra.mrb[0].mxu1 %vm131_vm5, %v122_v13  ;;  %v126_v18 = vld [vmem:[%s1789_s0 + $0x28] sm:$0xff]  ;;  %v127_v19 = vld [vmem:[%s1789_s0 + $0x30] sm:$0xff]  ;;  %v128_v20 = vld [vmem:[%s1789_s0 + $0x38] sm:$0xff]  ;;  %s1537_s0 = smov 64  }
   0xb   :  { %1389 = vmatpush3.bf16.msra.mxu0 %v1623_v14  ;;  %1270 = vmatprep.mubr.msk.f32.mxu1 %vm131_vm5, %v123_v15  ;;  %v1172_v21 = vld [vmem:[%s1794_s5] ss:$0 sm:$0xff]  ;;  %s1538_s5 = smov 32  }
   0xc   :  { %1390 = vmatprep.subr.bf16.mxu0 %v1536_v8  ;;  %1398 = vmatpush3.bf16.msra.mxu1 %v1607_v9 }
   0xd   :  { %1399 = vmatprep.subr.bf16.mxu1 %v1536_v8 }
   0xe   :  { %1271 = vmatmul.mubr.msk.f32.gmra.mrb[2].mxu1 %vm131_vm5, %v124_v16  ;;  %1288 = vmatmul.mubr.f32.vlgmr.msra.gmra.mrb[2].mxu0 %v1533_v2 }
   0xf   :  { %1273 = vmatprep.mubr.msk.f32.mxu1 %vm131_vm5, %v125_v17  ;;  %1392 = vmatpush3.bf16.msra.mxu0 %v1607_v9 }
  0x10   :  { %1393 = vmatprep.subr.bf16.mxu0 %v1536_v8  ;;  %1298 = vmatprep.mubr.msk.f32.mxu0 %vm1534_vm1, %v1533_v2 }
  0x11   :  { %1401 = vmatpush3.bf16.msra.mxu1 %v1623_v14 }
  0x12   :  { %1274 = vmatmul.mubr.msk.f32.gmra.mrb[4].mxu1 %vm131_vm5, %v126_v18  ;;  %1408 = vmatprep.subr.bf16.mxu1 %v1536_v8 }
  0x13   :  { %1276 = vmatprep.mubr.msk.f32.mxu1 %vm131_vm5, %v127_v19  ;;  %1395 = vmatpush3.bf16.msra.mxu0 %v1623_v14 }
  0x14   :  { %1402 = vmatprep.subr.bf16.mxu0 %v1536_v8 }
  0x16   :  { %1277 = vmatmul.mubr.msk.f32.gmra.mrb[6].mxu1 %vm131_vm5, %v128_v20 }
  0x17   :  { %1309 = vmatprep.mubr.msk.f32.mxu1 %vm1534_vm1, %v1533_v2 }
  0xd6   :  { %v117_v22 = vpop.f32.mrb[0].mxu0 }
  0xd7   :  { %v1262_v23 = vpop.f32.mrb[1].mxu0  ;;  %v118_v24 = vadd.f32 %v1172_v21, %v117_v22 }
  0xdd   :  { %v1269_v25 = vpop.f32.mrb[0].mxu1 }
  0xde   :  { %v364_v26 = vadd.f32 %v1269_v25, %v118_v24  ;;  %v225_v27 = vpop.f32.mrb[1].mxu1 }
  0xdf   :  { %v264_v28 = vadd.f32 %v225_v27, %v118_v24 }
  0xe1   :  { %v1272_v29 = vpop.f32.mrb[2].mxu1  ;;  %v335_v30 = vpop.f32.mrb[2].mxu0 }
  0xe2   :  { %v1672_v31 = vadd.f32 %v1272_v29, %v118_v24  ;;  %v339_v32 = vadd.f32 %v335_v30, %v264_v28  ;;  %v235_v33 = vpop.f32.mrb[3].mxu1  ;;  %v1289_v34 = vpop.f32.mrb[3].mxu0 }
  0xe3   :  { %v1674_v35 = vadd.f32 %v235_v33, %v118_v24 }
  0xe4   :  { %1445 = vtanh.f32 %v339_v32  ;;  %v1184_v45 = vmul.f32 -1.442695, %v339_v32 }
  0xe5   :  { %v1275_v36 = vpop.f32.mrb[4].mxu1 }
  0xe6   :  { %v1676_v37 = vadd.f32 %v1275_v36, %v118_v24  ;;  %v245_v38 = vpop.f32.mrb[5].mxu1  ;;  %1447 = vpow2.f32 %v1184_v45 }
  0xe7   :  { %v1678_v39 = vadd.f32 %v245_v38, %v118_v24 }
  0xe9   :  { %v1278_v40 = vpop.f32.mrb[6].mxu1 }
  0xea   :  { %v1680_v41 = vadd.f32 %v1278_v40, %v118_v24  ;;  %v255_v42 = vpop.f32.mrb[7].mxu1 }
  0xeb   :  { %v1682_v43 = vadd.f32 %v255_v42, %v118_v24 }
  0xee   :  { %v1446_v44 = vpop.eup %1445 }
  0xef   :  { %349 = vrot.lane.b32.xlu0 %v1446_v44, %s1537_s0 }
  0xf0   :  { %v1448_v46 = vpop.eup %1447 }
  0xf1   :  { %v343_v47 = vadd.f32 1.0, %v1448_v46 }
  0xf3   :  { %1449 = vrcp.f32 %v343_v47 }
  0xfd   :  { %v1450_v48 = vpop.eup %1449 }
  0xfe   :  { %v347_v51 = vmul.f32 0.0, %v1450_v48 }
 0x161   :  { %v350_v49 = vpop.permute.xlu0 %349 }
 0x162   :  { %v352_v50 = vmul.f32 %v1450_v48, %v350_v49 }
 0x164   :  { %354 = vrot.lane.b32.xlu0 %v352_v50, %s1538_s5 }
 0x1d6   :  { %v355_v52 = vpop.permute.xlu0 %354 }
 0x1d7   :  { %v357_v53 = vadd.f32 %v355_v52, %v347_v51 }
 0x1d9   :  { %1451 = vtanh.f32 %v357_v53 }
 0x1e3   :  { %v1452_v54 = vpop.eup %1451 }
 0x1e4   :  { %360 = vrot.lane.b32.xlu1 %v1452_v54, %s1537_s0 }
 0x256   :  { %v361_v55 = vpop.permute.xlu1 %360 }
 0x257   :  { %v363_v56 = vmul.f32 %v1450_v48, %v361_v55 }
 0x259   :  { %366 = vrot.lane.b32.xlu1 %v363_v56, %s1538_s5 }
 0x2cb   :  { %v367_v57 = vpop.permute.xlu1 %366 }
 0x2cc   :  { %1299 = vmatmul.mubr.msk.f32.vlgmr.msra.gmra.mrb[4].mxu0 %vm265_vm6, %v367_v57 }
 0x2cd   :  { %1404 = vmatpush3.bf16.msra.mxu0 %v1607_v9  ;;  %1320 = vmatprep.mubr.msk.f32.mxu0 %vm1534_vm1, %v1533_v2 }
 0x2ce   :  { %1405 = vmatprep.subr.bf16.mxu0 %v1536_v8 }
 0x2d1   :  { %1407 = vmatpush3.bf16.msra.mxu0 %v1623_v14 }
 0x2d2   :  { %1414 = vmatprep.subr.bf16.mxu0 %v1536_v8 }
 0x39f   :  { %v436_v58 = vpop.f32.mrb[4].mxu0 }
 0x3a0   :  { %v440_v59 = vadd.f32 %v436_v58, %v364_v26  ;;  %v1300_v60 = vpop.f32.mrb[5].mxu0 }
 0x3a2   :  { %1453 = vtanh.f32 %v440_v59  ;;  %v1186_v62 = vmul.f32 -1.442695, %v440_v59 }
 0x3a4   :  { %1455 = vpow2.f32 %v1186_v62 }
 0x3ac   :  { %v1454_v61 = vpop.eup %1453 }
 0x3ad   :  { %450 = vrot.lane.b32.xlu0 %v1454_v61, %s1537_s0 }
 0x3ae   :  { %v1456_v63 = vpop.eup %1455 }
 0x3af   :  { %v444_v0 = vadd.f32 1.0, %v1456_v63 }
 0x3b1   :  { %1457 = vrcp.f32 %v444_v0 }
 0x3bb   :  { %v1458_v1 = vpop.eup %1457 }
 0x3bc   :  { %v448_v5 = vmul.f32 %v1458_v1, %v357_v53 }
 0x41f   :  { %v451_v3 = vpop.permute.xlu0 %450 }
 0x420   :  { %v453_v4 = vmul.f32 %v1458_v1, %v451_v3 }
 0x422   :  { %455 = vrot.lane.b32.xlu1 %v453_v4, %s1538_s5 }
 0x494   :  { %v456_v6 = vpop.permute.xlu1 %455 }
 0x495   :  { %v458_v7 = vadd.f32 %v456_v6, %v448_v5 }
 0x497   :  { %1459 = vtanh.f32 %v458_v7 }
 0x4a1   :  { %v1460_v10 = vpop.eup %1459 }
 0x4a2   :  { %461 = vrot.lane.b32.xlu0 %v1460_v10, %s1537_s0 }
 0x514   :  { %v462_v11 = vpop.permute.xlu0 %461 }
 0x515   :  { %v464_v12 = vmul.f32 %v1458_v1, %v462_v11 }
 0x517   :  { %467 = vrot.lane.b32.xlu1 %v464_v12, %s1538_s5 }
 0x589   :  { %v468_v13 = vpop.permute.xlu1 %467 }
 0x58a   :  { %1310 = vmatmul.mubr.msk.f32.vlgmr.msra.gmra.mrb[8].mxu1 %vm265_vm6, %v468_v13 }
 0x58b   :  { %1410 = vmatpush3.bf16.msra.mxu1 %v1607_v9  ;;  %1331 = vmatprep.mubr.msk.f32.mxu1 %vm1534_vm1, %v1533_v2 }
 0x58c   :  { %1411 = vmatprep.subr.bf16.mxu1 %v1536_v8 }
 0x58f   :  { %1413 = vmatpush3.bf16.msra.mxu1 %v1623_v14 }
 0x590   :  { %1420 = vmatprep.subr.bf16.mxu1 %v1536_v8 }
 0x65d   :  { %v537_v15 = vpop.f32.mrb[8].mxu1 }
 0x65e   :  { %v541_v16 = vadd.f32 %v537_v15, %v1674_v35  ;;  %v1311_v17 = vpop.f32.mrb[9].mxu1 }
 0x660   :  { %1461 = vtanh.f32 %v541_v16  ;;  %v1188_v19 = vmul.f32 -1.442695, %v541_v16 }
 0x662   :  { %1463 = vpow2.f32 %v1188_v19 }
 0x66a   :  { %v1462_v18 = vpop.eup %1461 }
 0x66b   :  { %551 = vrot.lane.b32.xlu0 %v1462_v18, %s1537_s0 }
 0x66c   :  { %v1464_v20 = vpop.eup %1463 }
 0x66d   :  { %v545_v21 = vadd.f32 1.0, %v1464_v20 }
 0x66f   :  { %1465 = vrcp.f32 %v545_v21 }
 0x679   :  { %v1466_v22 = vpop.eup %1465 }
 0x67a   :  { %v549_v25 = vmul.f32 %v1466_v22, %v458_v7 }
 0x6dd   :  { %v552_v23 = vpop.permute.xlu0 %551 }
 0x6de   :  { %v554_v24 = vmul.f32 %v1466_v22, %v552_v23 }
 0x6e0   :  { %556 = vrot.lane.b32.xlu1 %v554_v24, %s1538_s5 }
 0x752   :  { %v557_v26 = vpop.permute.xlu1 %556 }
 0x753   :  { %v559_v27 = vadd.f32 %v557_v26, %v549_v25 }
 0x755   :  { %1467 = vtanh.f32 %v559_v27 }
 0x75f   :  { %v1468_v28 = vpop.eup %1467 }
 0x760   :  { %562 = vrot.lane.b32.xlu0 %v1468_v28, %s1537_s0 }
 0x7d2   :  { %v563_v29 = vpop.permute.xlu0 %562 }
 0x7d3   :  { %v565_v30 = vmul.f32 %v1466_v22, %v563_v29 }
 0x7d5   :  { %568 = vrot.lane.b32.xlu1 %v565_v30, %s1538_s5 }
 0x847   :  { %v569_v32 = vpop.permute.xlu1 %568 }
 0x848   :  { %1321 = vmatmul.mubr.msk.f32.vlgmr.msra.gmra.mrb[6].mxu0 %vm265_vm6, %v569_v32 }
 0x849   :  { %1416 = vmatpush3.bf16.msra.mxu0 %v1607_v9  ;;  %1342 = vmatprep.mubr.msk.f32.mxu0 %vm1534_vm1, %v1533_v2 }
 0x84a   :  { %1417 = vmatprep.subr.bf16.mxu0 %v1536_v8 }
 0x84d   :  { %1419 = vmatpush3.bf16.msra.mxu0 %v1623_v14 }
 0x84e   :  { %1426 = vmatprep.subr.bf16.mxu0 %v1536_v8 }
 0x91b   :  { %v638_v33 = vpop.f32.mrb[6].mxu0 }
 0x91c   :  { %v642_v34 = vadd.f32 %v638_v33, %v1672_v31  ;;  %v1322_v35 = vpop.f32.mrb[7].mxu0 }
 0x91e   :  { %1469 = vtanh.f32 %v642_v34  ;;  %v1190_v38 = vmul.f32 -1.442695, %v642_v34 }
 0x920   :  { %1471 = vpow2.f32 %v1190_v38 }
 0x928   :  { %v1470_v36 = vpop.eup %1469 }
 0x929   :  { %652 = vrot.lane.b32.xlu0 %v1470_v36, %s1537_s0 }
 0x92a   :  { %v1472_v40 = vpop.eup %1471 }
 0x92b   :  { %v646_v42 = vadd.f32 1.0, %v1472_v40 }
 0x92d   :  { %1473 = vrcp.f32 %v646_v42 }
 0x937   :  { %v1474_v44 = vpop.eup %1473 }
 0x938   :  { %v650_v47 = vmul.f32 %v1474_v44, %v559_v27 }
 0x99b   :  { %v653_v45 = vpop.permute.xlu0 %652 }
 0x99c   :  { %v655_v46 = vmul.f32 %v1474_v44, %v653_v45 }
 0x99e   :  { %657 = vrot.lane.b32.xlu1 %v655_v46, %s1538_s5 }
 0xa10   :  { %v658_v48 = vpop.permute.xlu1 %657 }
 0xa11   :  { %v660_v49 = vadd.f32 %v658_v48, %v650_v47 }
 0xa13   :  { %1475 = vtanh.f32 %v660_v49 }
 0xa1d   :  { %v1476_v31 = vpop.eup %1475 }
 0xa1e   :  { %663 = vrot.lane.b32.xlu0 %v1476_v31, %s1537_s0 }
 0xa90   :  { %v664_v50 = vpop.permute.xlu0 %663 }
 0xa91   :  { %v666_v51 = vmul.f32 %v1474_v44, %v664_v50 }
 0xa93   :  { %669 = vrot.lane.b32.xlu1 %v666_v51, %s1538_s5 }
 0xb05   :  { %v670_v52 = vpop.permute.xlu1 %669 }
 0xb06   :  { %1332 = vmatmul.mubr.msk.f32.vlgmr.msra.gmra.mrb[10].mxu1 %vm265_vm6, %v670_v52 }
 0xb07   :  { %1422 = vmatpush3.bf16.msra.mxu1 %v1607_v9  ;;  %1353 = vmatprep.mubr.msk.f32.mxu1 %vm1534_vm1, %v1533_v2 }
 0xb08   :  { %1423 = vmatprep.subr.bf16.mxu1 %v1536_v8 }
 0xb0b   :  { %1425 = vmatpush3.bf16.msra.mxu1 %v1623_v14 }
 0xb0c   :  { %1432 = vmatprep.subr.bf16.mxu1 %v1536_v8 }
 0xbd9   :  { %v739_v53 = vpop.f32.mrb[10].mxu1 }
 0xbda   :  { %v743_v54 = vadd.f32 %v739_v53, %v1678_v39  ;;  %v1333_v55 = vpop.f32.mrb[11].mxu1 }
 0xbdb   :  { %v1072_v55 = vld [vmem:[%s1795_s6 + $0x8] sm:$0xff] }
 0xbdc   :  { %1477 = vtanh.f32 %v743_v54  ;;  %v1192_v57 = vmul.f32 -1.442695, %v743_v54 }
 0xbde   :  { %1479 = vpow2.f32 %v1192_v57 }
 0xbe6   :  { %v1478_v56 = vpop.eup %1477 }
 0xbe7   :  { %753 = vrot.lane.b32.xlu0 %v1478_v56, %s1537_s0  ;;  %v1073_v56 = vld [vmem:[%s1795_s6 + $0x10] sm:$0xff] }
 0xbe8   :  { %v1480_v58 = vpop.eup %1479 }
 0xbe9   :  { %v747_v59 = vadd.f32 1.0, %v1480_v58  ;;  %v1074_v58 = vld [vmem:[%s1795_s6 + $0x18] sm:$0xff] }
 0xbeb   :  { %1481 = vrcp.f32 %v747_v59  ;;  %v1436_v59 = vpack.c.bf16 %v1074_v58, %v1073_v56 }
 0xbf5   :  { %v1482_v60 = vpop.eup %1481 }
 0xbf6   :  { %v751_v63 = vmul.f32 %v1482_v60, %v660_v49 }
 0xc59   :  { %v754_v61 = vpop.permute.xlu0 %753 }
 0xc5a   :  { %v756_v62 = vmul.f32 %v1482_v60, %v754_v61 }
 0xc5c   :  { %758 = vrot.lane.b32.xlu1 %v756_v62, %s1538_s5 }
 0xcce   :  { %v759_v0 = vpop.permute.xlu1 %758 }
 0xccf   :  { %v761_v1 = vadd.f32 %v759_v0, %v751_v63  ;;  %v1199_v0 = vld [vmem:[%s1796_s7] ss:$0 sm:$0xff] }
 0xcd1   :  { %1483 = vtanh.f32 %v761_v1 }
 0xcdb   :  { %v1484_v39 = vpop.eup %1483 }
 0xcdc   :  { %764 = vrot.lane.b32.xlu0 %v1484_v39, %s1537_s0 }
 0xd4e   :  { %v765_v3 = vpop.permute.xlu0 %764 }
 0xd4f   :  { %v767_v4 = vmul.f32 %v1482_v60, %v765_v3 }
 0xd51   :  { %770 = vrot.lane.b32.xlu1 %v767_v4, %s1538_s5 }
 0xdc3   :  { %v771_v5 = vpop.permute.xlu1 %770 }
 0xdc4   :  { %1343 = vmatmul.mubr.msk.f32.vlgmr.msra.gmra.mrb[8].mxu0 %vm265_vm6, %v771_v5 }
 0xdc5   :  { %1428 = vmatpush3.bf16.msra.mxu0 %v1607_v9  ;;  %1364 = vmatprep.mubr.msk.f32.mxu0 %vm1534_vm1, %v1533_v2 }
 0xdc6   :  { %1429 = vmatprep.subr.bf16.mxu0 %v1536_v8 }
 0xdc9   :  { %1431 = vmatpush3.bf16.msra.mxu0 %v1623_v14 }
 0xe97   :  { %v840_v6 = vpop.f32.mrb[8].mxu0 }
 0xe98   :  { %v844_v7 = vadd.f32 %v840_v6, %v1676_v37  ;;  %v1344_v10 = vpop.f32.mrb[9].mxu0 }
 0xe9a   :  { %1485 = vtanh.f32 %v844_v7  ;;  %v1194_v12 = vmul.f32 -1.442695, %v844_v7 }
 0xe9c   :  { %1487 = vpow2.f32 %v1194_v12 }
 0xea4   :  { %v1486_v11 = vpop.eup %1485 }
 0xea5   :  { %854 = vrot.lane.b32.xlu0 %v1486_v11, %s1537_s0 }
 0xea6   :  { %v1488_v13 = vpop.eup %1487 }
 0xea7   :  { %v848_v15 = vadd.f32 1.0, %v1488_v13 }
 0xea9   :  { %1489 = vrcp.f32 %v848_v15 }
 0xeb3   :  { %v1490_v9 = vpop.eup %1489 }
 0xeb4   :  { %v852_v18 = vmul.f32 %v1490_v9, %v761_v1 }
 0xf17   :  { %v855_v16 = vpop.permute.xlu0 %854 }
 0xf18   :  { %v857_v17 = vmul.f32 %v1490_v9, %v855_v16 }
 0xf1a   :  { %859 = vrot.lane.b32.xlu1 %v857_v17, %s1538_s5 }
 0xf8c   :  { %v860_v14 = vpop.permute.xlu1 %859 }
 0xf8d   :  { %v862_v19 = vadd.f32 %v860_v14, %v852_v18 }
 0xf8f   :  { %1491 = vtanh.f32 %v862_v19 }
 0xf99   :  { %v1492_v37 = vpop.eup %1491 }
 0xf9a   :  { %865 = vrot.lane.b32.xlu0 %v1492_v37, %s1537_s0 }
0x100c   :  { %v866_v20 = vpop.permute.xlu0 %865 }
0x100d   :  { %v868_v21 = vmul.f32 %v1490_v9, %v866_v20 }
0x100f   :  { %871 = vrot.lane.b32.xlu1 %v868_v21, %s1538_s5 }
0x1081   :  { %v872_v22 = vpop.permute.xlu1 %871 }
0x1082   :  { %1354 = vmatmul.mubr.msk.f32.vlgmr.msra.gmra.mrb[12].mxu1 %vm265_vm6, %v872_v22 }
0x1083   :  { %1375 = vmatprep.mubr.msk.f32.mxu1 %vm1534_vm1, %v1533_v2 }
0x1155   :  { %v941_v23 = vpop.f32.mrb[12].mxu1 }
0x1156   :  { %v945_v24 = vadd.f32 %v941_v23, %v1682_v43  ;;  %v1355_v25 = vpop.f32.mrb[13].mxu1 }
0x1158   :  { %1493 = vtanh.f32 %v945_v24  ;;  %v1196_v27 = vmul.f32 -1.442695, %v945_v24 }
0x115a   :  { %1495 = vpow2.f32 %v1196_v27 }
0x1162   :  { %v1494_v26 = vpop.eup %1493 }
0x1163   :  { %955 = vrot.lane.b32.xlu0 %v1494_v26, %s1537_s0 }
0x1164   :  { %v1496_v28 = vpop.eup %1495 }
0x1165   :  { %v949_v29 = vadd.f32 1.0, %v1496_v28 }
0x1167   :  { %1497 = vrcp.f32 %v949_v29 }
0x1171   :  { %v1498_v30 = vpop.eup %1497 }
0x1172   :  { %v953_v34 = vmul.f32 %v1498_v30, %v862_v19 }
0x11d5   :  { %v956_v32 = vpop.permute.xlu0 %955 }
0x11d6   :  { %v958_v33 = vmul.f32 %v1498_v30, %v956_v32 }
0x11d8   :  { %960 = vrot.lane.b32.xlu1 %v958_v33, %s1538_s5 }
0x124a   :  { %v961_v2 = vpop.permute.xlu1 %960 }
0x124b   :  { %v963_v35 = vadd.f32 %v961_v2, %v953_v34 }
0x124d   :  { %1499 = vtanh.f32 %v963_v35 }
0x1257   :  { %v1500_v43 = vpop.eup %1499 }
0x1258   :  { %966 = vrot.lane.b32.xlu0 %v1500_v43, %s1537_s0 }
0x12ca   :  { %v967_v36 = vpop.permute.xlu0 %966 }
0x12cb   :  { %v969_v38 = vmul.f32 %v1498_v30, %v967_v36 }
0x12cd   :  { %972 = vrot.lane.b32.xlu1 %v969_v38, %s1538_s5 }
0x133f   :  { %v973_v40 = vpop.permute.xlu1 %972 }
0x1340   :  { %1365 = vmatmul.mubr.msk.f32.vlgmr.msra.gmra.mrb[10].mxu0 %vm265_vm6, %v973_v40 }
0x1413   :  { %v1042_v42 = vpop.f32.mrb[10].mxu0 }
0x1414   :  { %v1046_v44 = vadd.f32 %v1042_v42, %v1680_v41  ;;  %v1366_v45 = vpop.f32.mrb[11].mxu0  ;;  %v1071_v41 = vld [vmem:[%s1795_s6] sm:$0xff]  ;;  %s1539_s6 = smov [#allocation2]  }
0x1415   :  { %v1433_v57 = vpack.c.bf16 %v1072_v55, %v1071_v41  ;;  %s1164_s20 = sshll.u32 %s1539_s6, 4  ;;  %s1165_s20 = int_to_ptr.vmem [resolvable:$true] %s1164_s20 }
0x1416   :  { %1501 = vtanh.f32 %v1046_v44  ;;  %v1198_v47 = vmul.f32 -1.442695, %v1046_v44  ;;  %s1509_s21 = scalar_lea.vmem %s1165_s20, 128  ;;  %p1514_p1 = scmp.lt.s32.totalorder %s1165_s20, %s1165_s20 }
0x1417   :  { %1434 = vmatpush3.bf16.msra.mxu1 %v1433_v57  ;;  %p1510_p0 = scmp.ne.s32.totalorder %s1165_s20, %s1509_s21  ;;  %p1515_p2 = scmp.lt.s32.totalorder %s1509_s21, %s1509_s21 }
0x1418   :  { %1503 = vpow2.f32 %v1198_v47  ;;  %1435 = vmatprep.subr.bf16.mxu1 %v1536_v8 }
0x1419   :  { %p1516_p3 = por %p1515_p2, %p1514_p1 }
0x141b   :  { %1437 = vmatpush3.bf16.msra.mxu1 %v1436_v59  ;;  %p1517_p4 = pnand %p1516_p3, %p1510_p0 }
0x1420   :  { %v1502_v46 = vpop.eup %1501 }
0x1421   :  { %1056 = vrot.lane.b32.xlu0 %v1502_v46, %s1537_s0 }
0x1422   :  { %v1504_v48 = vpop.eup %1503 }
0x1423   :  { %v1050_v49 = vadd.f32 1.0, %v1504_v48 }
0x1425   :  { %1505 = vrcp.f32 %v1050_v49 }
0x142f   :  { %v1506_v31 = vpop.eup %1505 }
0x1430   :  { %v1054_v52 = vmul.f32 %v1506_v31, %v963_v35 }
0x1493   :  { %v1057_v50 = vpop.permute.xlu0 %1056 }
0x1494   :  { %v1059_v51 = vmul.f32 %v1506_v31, %v1057_v50 }
0x1496   :  { %1061 = vrot.lane.b32.xlu1 %v1059_v51, %s1538_s5 }
0x1508   :  { %v1062_v53 = vpop.permute.xlu1 %1061 }
0x1509   :  { %v1064_v54 = vadd.f32 %v1062_v53, %v1054_v52 }
0x150b   :  { %1507 = vtanh.f32 %v1064_v54 }
0x1515   :  { %v1508_v60 = vpop.eup %1507 }
0x1516   :  { %1067 = vrot.lane.b32.xlu0 %v1508_v60, %s1537_s0 }
0x1588   :  { %v1068_v61 = vpop.permute.xlu0 %1067 }
0x1589   :  { %v1070_v62 = vmul.f32 %v1506_v31, %v1068_v61 }
0x158b   :  { %1083 = vrot.lane.b32.xlu1 %v1070_v62, %s1538_s5 }
0x15fd   :  { %v1084_v63 = vpop.permute.xlu1 %1083 }
0x15fe   :  { %1376 = vmatmul.mubr.msk.f32.vlgmr.msra.gmra.mrb[14].mxu1 %vm265_vm6, %v1084_v63 }
0x16d1   :  { %v1153_v1 = vpop.f32.mrb[14].mxu1 }
0x16d2   :  { %v1154_v39 = vadd.f32 %v1199_v0, %v1153_v1  ;;  %v1377_v8 = vpop.f32.mrb[15].mxu1 }
0x16d4   :  { %1157 = vst [vmem:[#allocation2] sm:$0xff] %v1154_v39 }
0x16d5   :  { %1520 = shalt.err (!%p1517_p4)
}
0x16d6   :  { %s1521_s4 = scalar_lea.hbm %s1797_s8, 128 }
0x16d7   :  { %p1522_p5 = scmp.ne.s32.totalorder %s1797_s8, %s1521_s4  ;;  %p1525_p6 = scmp.lt.u32.totalorder %s1521_s4, %s1797_s8 }
0x16d9   :  { %p1527_p7 = pnand %p1525_p6, %p1522_p5 }
0x16db   :  { %1530 = shalt.err (!%p1527_p7)
}
0x16dc   :  { %1167 = dma.vmem_to_hbm [thread:$0]  %s1165_s20, 128, %s1797_s8, [#allocation3]  }
0x16dd   :  { %1531 = dma.done.wait [#allocation3], 128  }
0x16de   :  { %1532 = vsyncadd [#allocation3], 4294967168 }
0x16df   :  { %1171 = vsyncpa [#allocation3], 1 }

</bundles_post_ra>
